<compile_context>
chip_gen: v5e
topology: v5e:2x2
jax: 0.10.0
libtpu: 0.0.40
codegen_flags: <defaults>
</compile_context>

<pallas_src>
import functools

import jax
import jax.numpy as jnp
from jax.experimental import pallas as pl
from jax.experimental.pallas import tpu as pltpu


# ----------------------------------------------------------------------------
# Fused Pallas kernel: entire network for one batch element per grid step.
# ----------------------------------------------------------------------------
def _fused_forward_kernel(xx_ref, sc_ref, *refs, meta):
    """refs = (w0, b0, wc0, bc0, [w1, b1, wconf, bconf, w2, b2]*nblocks,
               w_shrink, b_shrink, o_ref)

    xx_ref: (1, 2J, T)   coordinate stream          (VMEM)
    sc_ref: (1, J, T)    confidence stream          (VMEM)
    w*:     (C_out, K*C_in) bf16, BN pre-folded     (VMEM)
    b*:     (C_out, 1)  f32                         (VMEM)
    o_ref:  (1, 3*Jout, L_out)                      (VMEM)
    """
    o_ref = refs[-1]
    it = iter(refs[:-1])

    def conv_bn_relu(x, w_ref, b_ref, K, dilation, relu=True):
        # x: (C_in, L_in) f32.  Merged-tap matmul: build the im2col slab once
        # and do a single (C_out x K*C_in) @ (K*C_in x L_out) MXU dot
        # (bf16 operands, f32 accumulation).
        L_in = x.shape[1]
        L_out = L_in - (K - 1) * dilation
        if K == 1:
            xcol = x
        else:
            xcol = jnp.concatenate(
                [x[:, k * dilation:k * dilation + L_out] for k in range(K)],
                axis=0)                                   # (K*C_in, L_out)
        y = jnp.dot(w_ref[...], xcol.astype(jnp.bfloat16),
                    preferred_element_type=jnp.float32)
        y = y + b_ref[...]                                # folded-BN bias
        if relu:
            y = jnp.maximum(y, 0.0)
        return y

    xx = xx_ref[0].astype(jnp.float32)                    # (2J, T)
    sc = sc_ref[0].astype(jnp.float32)                    # (J, T)

    # TODO(synk): _forward_blocks is not defined on ConfTemporalModelV3BaseOld
    # (it lives in a subclass); block wiring below is inferred from the layers
    # declared in __init__ (dilated VideoPose3D blocks, confidence stream
    # gating the pose stream).  BatchNorm is eval-mode; dropout is identity.
    fw0 = meta["fw0"]
    w, b = next(it), next(it)
    xx = conv_bn_relu(xx, w, b, fw0, 1)                   # expand_conv + bn + relu
    w, b = next(it), next(it)
    sc = conv_bn_relu(sc, w, b, fw0, 1)                   # expand_conv_conf + bn + relu
    xx = xx * sc                                          # confidence gating (fused)

    for (K, dilation, pad) in meta["blocks"]:
        res = xx[:, pad:xx.shape[1] - pad]                # residual slice (causal_shift = 0)
        w, b = next(it), next(it)
        xx = conv_bn_relu(xx, w, b, K, dilation)          # dilated conv1 + bn + relu
        w, b = next(it), next(it)
        sc = conv_bn_relu(sc, w, b, K, dilation)          # conf conv + bn + relu
        xx = xx * sc                                      # gating (fused epilogue)
        w, b = next(it), next(it)
        xx = conv_bn_relu(xx, w, b, 1, 1)                 # 1x1 conv2 + bn + relu
        xx = res + xx                                     # residual add (fused epilogue)

    w, b = next(it), next(it)
    xx = conv_bn_relu(xx, w, b, 1, 1, relu=False)         # shrink (bias, no BN/ReLU)
    o_ref[0] = xx.astype(o_ref.dtype)


def fused_forward(xx, sc, weights, meta):
    """xx: (B, 2J, T), sc: (B, J, T) -> (B, 3*Jout, L_out). One pallas_call."""
    B, _, T = xx.shape
    L = T - (meta["fw0"] - 1)
    for (K, d, _pad) in meta["blocks"]:
        L -= (K - 1) * d
    C_final = meta["c_final"]

    kern = functools.partial(_fused_forward_kernel, meta=meta)
    in_specs = [
        pl.BlockSpec((1,) + xx.shape[1:], lambda b: (b, 0, 0)),
        pl.BlockSpec((1,) + sc.shape[1:], lambda b: (b, 0, 0)),
    ]
    # Weights: constant block index -> fetched once, kept resident across the
    # batch grid.  At production channel counts (C~1024, bf16 already halves
    # footprint) additionally pin them (pipeline_mode=pl.Buffered(1) /
    # persistent VMEM scratch) to avoid the redundant second buffer under
    # v7x's 64 MiB VMEM.
    in_specs += [pl.BlockSpec(w.shape, lambda b: (0, 0)) for w in weights]

    return pl.pallas_call(
        kern,
        out_shape=jax.ShapeDtypeStruct((B, C_final, L), xx.dtype),
        grid=(B,),
        in_specs=in_specs,
        out_specs=pl.BlockSpec((1, C_final, L), lambda b: (b, 0, 0)),
        compiler_params=pltpu.CompilerParams(
            dimension_semantics=("parallel",)),   # shards batch over v7x's 2 TCs
    )(xx, sc, *weights)


# ----------------------------------------------------------------------------
# Parameter construction (deterministic, synthetic) + one-time preparation:
# fold eval-mode BN into conv weights, merge K taps, cast weights to bf16.
# ----------------------------------------------------------------------------
def bn_affine(bn_params, eps=1e-5):
    gamma, beta, mean, var = bn_params
    scale = gamma / jnp.sqrt(var + eps)
    bias = beta - mean * scale
    return scale, bias


def _fold_conv_bn(w, bn):
    """w: (C_out, C_in, K) torch-layout conv weight -> ((C_out, K*C_in) bf16,
    (C_out, 1) f32 bias) with eval-mode BN folded in."""
    scale, bias = bn_affine(bn)
    w = w * scale[:, None, None]
    C_out, C_in, K = w.shape
    wm = jnp.transpose(w, (0, 2, 1)).reshape(C_out, K * C_in)   # [k*C_in + c_in]
    return wm.astype(jnp.bfloat16), bias.reshape(C_out, 1).astype(jnp.float32)


def prepare_params(p, filter_widths):
    """Done ONCE, outside the hot path."""
    weights = []
    w, b = _fold_conv_bn(p["expand_conv_w"], p["expand_bn"]); weights += [w, b]
    w, b = _fold_conv_bn(p["expand_conv_conf_w"], p["expand_bn_conf"]); weights += [w, b]
    blocks_meta = []
    for blk in p["blocks"]:
        w, b = _fold_conv_bn(blk["conv1_w"], blk["bn1"]); weights += [w, b]
        w, b = _fold_conv_bn(blk["conv_conf_w"], blk["bn_conf"]); weights += [w, b]
        w, b = _fold_conv_bn(blk["conv2_w"], blk["bn2"]); weights += [w, b]
        blocks_meta.append((blk["conv1_w"].shape[2], blk["dilation"], blk["pad"]))
    # shrink: Conv1d(channels, 3*J_out, 1) with bias, no BN, no ReLU.
    wsh = p["shrink_w"]                                   # (3*Jout, C, 1)
    C_out = wsh.shape[0]
    weights.append(jnp.transpose(wsh, (0, 2, 1)).reshape(C_out, -1)
                   .astype(jnp.bfloat16))
    weights.append(p["shrink_b"].reshape(C_out, 1).astype(jnp.float32))
    meta = {"fw0": filter_widths[0], "blocks": blocks_meta, "c_final": C_out}
    return tuple(weights), meta


def init_params(key, num_joints_in, num_joints_out, filter_widths, channels):
    def nrm(k, shape, std=0.1):
        return std * jax.random.normal(k, shape, jnp.float32)

    def bn(k, c):
        k1, k2, k3, k4 = jax.random.split(k, 4)
        gamma = 1.0 + 0.1 * jax.random.normal(k1, (c,), jnp.float32)
        beta = 0.1 * jax.random.normal(k2, (c,), jnp.float32)
        mean = 0.1 * jax.random.normal(k3, (c,), jnp.float32)
        var = 1.0 + 0.1 * jax.random.uniform(k4, (c,), jnp.float32)
        return (gamma, beta, mean, var)

    keys = iter(jax.random.split(key, 64))
    p = {}
    p["expand_conv_w"] = nrm(next(keys), (channels, num_joints_in * 2, filter_widths[0]))
    p["expand_conv_conf_w"] = nrm(next(keys), (channels, num_joints_in, filter_widths[0]))
    p["expand_bn"] = bn(next(keys), channels)
    p["expand_bn_conf"] = bn(next(keys), channels)
    p["blocks"] = []
    next_dilation = filter_widths[0]
    for i in range(1, len(filter_widths)):
        pad = (filter_widths[i] - 1) * next_dilation // 2
        blk = {
            "conv1_w": nrm(next(keys), (channels, channels, filter_widths[i])),
            "bn1": bn(next(keys), channels),
            "conv2_w": nrm(next(keys), (channels, channels, 1)),
            "bn2": bn(next(keys), channels),
            "conv_conf_w": nrm(next(keys), (channels, channels, filter_widths[i])),
            "bn_conf": bn(next(keys), channels),
            "dilation": next_dilation,
            "pad": pad,
        }
        p["blocks"].append(blk)
        next_dilation *= filter_widths[i]
    p["shrink_w"] = nrm(next(keys), (num_joints_out * 3, channels, 1))
    p["shrink_b"] = nrm(next(keys), (num_joints_out * 3,))
    return p


# ----------------------------------------------------------------------------
# Forward pass (mirrors ConfTemporalModelV3BaseOld.forward), jit-wrapped.
# ----------------------------------------------------------------------------
def make_forward(meta, num_joints_in, in_features, num_joints_out):
    @jax.jit
    def forward(x, weights):
        assert x.ndim == 4
        assert x.shape[-2] == num_joints_in
        assert x.shape[-1] == in_features
        B, T = x.shape[0], x.shape[1]
        scr = x[..., -1]                                  # (B, T, J) confidence
        xy = x[..., :-1].reshape(B, T, -1)                # (B, T, 2J) coordinates
        xx = jnp.transpose(xy, (0, 2, 1))                 # (B, 2J, T)
        sc = jnp.transpose(scr, (0, 2, 1))                # (B, J, T)
        out = fused_forward(xx, sc, weights, meta)        # (B, 3*Jout, L_out)
        out = jnp.transpose(out, (0, 2, 1))               # (B, L_out, 3*Jout)
        return out.reshape(B, -1, num_joints_out, 3)
    return forward


# ----------------------------------------------------------------------------
if __name__ == "__main__":
    # Small config: 4 input joints, in_features = 3 (x, y, confidence),
    # 4 output joints, filter_widths = [3, 3], channels = 32.
    num_joints_in = 4
    in_features = 3
    num_joints_out = 4
    filter_widths = [3, 3]
    channels = 32

    B, T = 2, 16                                          # receptive field = 9 <= T
    key = jax.random.PRNGKey(0)
    k_x, k_p = jax.random.split(key)
    x = jax.random.normal(k_x, (B, T, num_joints_in, in_features), jnp.float32)

    params = init_params(k_p, num_joints_in, num_joints_out, filter_widths, channels)
    weights, meta = prepare_params(params, filter_widths)   # BN fold / bf16 / merge: once
    forward = make_forward(meta, num_joints_in, in_features, num_joints_out)

    out = forward(x, weights)
    out = jax.block_until_ready(out)

    expected_len = (T - 2 * (filter_widths[0] // 2)
                    - 2 * ((filter_widths[1] - 1) * filter_widths[0] // 2))
    assert out.shape == (B, expected_len, num_joints_out, 3), out.shape
    assert jnp.all(jnp.isfinite(out))
    print("KERNEL_OK")
</pallas_src>

<mosaic_0001>
module attributes {stable_mosaic.version = 11 : i64} {
  func.func @_fused_forward_kernel(%arg0: i32, %arg1: memref<1x8x16xf32, #tpu.memory_space<vmem>>, %arg2: memref<1x4x16xf32, #tpu.memory_space<vmem>>, %arg3: memref<32x24xbf16, #tpu.memory_space<vmem>>, %arg4: memref<32x1xf32, #tpu.memory_space<vmem>>, %arg5: memref<32x12xbf16, #tpu.memory_space<vmem>>, %arg6: memref<32x1xf32, #tpu.memory_space<vmem>>, %arg7: memref<32x96xbf16, #tpu.memory_space<vmem>>, %arg8: memref<32x1xf32, #tpu.memory_space<vmem>>, %arg9: memref<32x96xbf16, #tpu.memory_space<vmem>>, %arg10: memref<32x1xf32, #tpu.memory_space<vmem>>, %arg11: memref<32x32xbf16, #tpu.memory_space<vmem>>, %arg12: memref<32x1xf32, #tpu.memory_space<vmem>>, %arg13: memref<12x32xbf16, #tpu.memory_space<vmem>>, %arg14: memref<12x1xf32, #tpu.memory_space<vmem>>, %arg15: memref<1x12x8xf32, #tpu.memory_space<vmem>>) attributes {dimension_semantics = [#tpu.dimension_semantics<parallel>], iteration_bounds = array<i64: 2>, scalar_prefetch = 0 : i64, scratch_operands = 0 : i64, tpu.core_type = #tpu.core_type<tc>, window_params = [{transform_indices = @transform_0, window_bounds = array<i64: 1, 8, 16>}, {transform_indices = @transform_1, window_bounds = array<i64: 1, 4, 16>}, {pipeline_mode = #tpu.pipeline_mode<synchronous>, transform_indices = @transform_2, window_bounds = array<i64: 32, 24>}, {pipeline_mode = #tpu.pipeline_mode<synchronous>, transform_indices = @transform_3, window_bounds = array<i64: 32, 1>}, {pipeline_mode = #tpu.pipeline_mode<synchronous>, transform_indices = @transform_4, window_bounds = array<i64: 32, 12>}, {pipeline_mode = #tpu.pipeline_mode<synchronous>, transform_indices = @transform_5, window_bounds = array<i64: 32, 1>}, {pipeline_mode = #tpu.pipeline_mode<synchronous>, transform_indices = @transform_6, window_bounds = array<i64: 32, 96>}, {pipeline_mode = #tpu.pipeline_mode<synchronous>, transform_indices = @transform_7, window_bounds = array<i64: 32, 1>}, {pipeline_mode = #tpu.pipeline_mode<synchronous>, transform_indices = @transform_8, window_bounds = array<i64: 32, 96>}, {pipeline_mode = #tpu.pipeline_mode<synchronous>, transform_indices = @transform_9, window_bounds = array<i64: 32, 1>}, {pipeline_mode = #tpu.pipeline_mode<synchronous>, transform_indices = @transform_10, window_bounds = array<i64: 32, 32>}, {pipeline_mode = #tpu.pipeline_mode<synchronous>, transform_indices = @transform_11, window_bounds = array<i64: 32, 1>}, {pipeline_mode = #tpu.pipeline_mode<synchronous>, transform_indices = @transform_12, window_bounds = array<i64: 12, 32>}, {pipeline_mode = #tpu.pipeline_mode<synchronous>, transform_indices = @transform_13, window_bounds = array<i64: 12, 1>}, {transform_indices = @transform_14, window_bounds = array<i64: 1, 12, 8>}]} {
    %c0 = arith.constant 0 : index
    %c0_0 = arith.constant 0 : index
    %c0_1 = arith.constant 0 : index
    %0 = vector.load %arg1[%c0, %c0_0, %c0_1] : memref<1x8x16xf32, #tpu.memory_space<vmem>>, vector<1x8x16xf32>
    %1 = vector.shape_cast %0 : vector<1x8x16xf32> to vector<8x16xf32>
    %c0_2 = arith.constant 0 : index
    %c0_3 = arith.constant 0 : index
    %c0_4 = arith.constant 0 : index
    %2 = vector.load %arg2[%c0_2, %c0_3, %c0_4] : memref<1x4x16xf32, #tpu.memory_space<vmem>>, vector<1x4x16xf32>
    %3 = vector.shape_cast %2 : vector<1x4x16xf32> to vector<4x16xf32>
    %4 = vector.extract_strided_slice %1 {offsets = [0, 0], sizes = [8, 14], strides = [1, 1]} : vector<8x16xf32> to vector<8x14xf32>
    %5 = vector.extract_strided_slice %1 {offsets = [0, 1], sizes = [8, 14], strides = [1, 1]} : vector<8x16xf32> to vector<8x14xf32>
    %6 = vector.extract_strided_slice %1 {offsets = [0, 2], sizes = [8, 14], strides = [1, 1]} : vector<8x16xf32> to vector<8x14xf32>
    %7 = tpu.concatenate %4, %5, %6 in 0 : vector<8x14xf32>, vector<8x14xf32>, vector<8x14xf32> -> vector<24x14xf32>
    %c0_5 = arith.constant 0 : index
    %c0_6 = arith.constant 0 : index
    %8 = vector.load %arg3[%c0_5, %c0_6] : memref<32x24xbf16, #tpu.memory_space<vmem>>, vector<32x24xbf16>
    %9 = arith.truncf %7 : vector<24x14xf32> to vector<24x14xbf16>
    %cst = arith.constant dense<0.000000e+00> : vector<32x14xf32>
    %10 = tpu.matmul %8, %9, %cst {dimension_numbers = #tpu.dot_dimension_numbers<[1], [0], [0], [1], [0, 0, 1, 1], [], []>} : vector<32x24xbf16>, vector<24x14xbf16>, vector<32x14xf32> -> vector<32x14xf32>
    %c0_7 = arith.constant 0 : index
    %c0_8 = arith.constant 0 : index
    %11 = vector.load %arg4[%c0_7, %c0_8] : memref<32x1xf32, #tpu.memory_space<vmem>>, vector<32x1xf32>
    %12 = vector.broadcast %11 : vector<32x1xf32> to vector<32x14xf32>
    %13 = arith.addf %10, %12 : vector<32x14xf32>
    %cst_9 = arith.constant 0.000000e+00 : f32
    %14 = vector.broadcast %cst_9 : f32 to vector<32x14xf32>
    %15 = arith.maximumf %13, %14 : vector<32x14xf32>
    %16 = vector.extract_strided_slice %3 {offsets = [0, 0], sizes = [4, 14], strides = [1, 1]} : vector<4x16xf32> to vector<4x14xf32>
    %17 = vector.extract_strided_slice %3 {offsets = [0, 1], sizes = [4, 14], strides = [1, 1]} : vector<4x16xf32> to vector<4x14xf32>
    %18 = vector.extract_strided_slice %3 {offsets = [0, 2], sizes = [4, 14], strides = [1, 1]} : vector<4x16xf32> to vector<4x14xf32>
    %19 = tpu.concatenate %16, %17, %18 in 0 : vector<4x14xf32>, vector<4x14xf32>, vector<4x14xf32> -> vector<12x14xf32>
    %c0_10 = arith.constant 0 : index
    %c0_11 = arith.constant 0 : index
    %20 = vector.load %arg5[%c0_10, %c0_11] : memref<32x12xbf16, #tpu.memory_space<vmem>>, vector<32x12xbf16>
    %21 = arith.truncf %19 : vector<12x14xf32> to vector<12x14xbf16>
    %cst_12 = arith.constant dense<0.000000e+00> : vector<32x14xf32>
    %22 = tpu.matmul %20, %21, %cst_12 {dimension_numbers = #tpu.dot_dimension_numbers<[1], [0], [0], [1], [0, 0, 1, 1], [], []>} : vector<32x12xbf16>, vector<12x14xbf16>, vector<32x14xf32> -> vector<32x14xf32>
    %c0_13 = arith.constant 0 : index
    %c0_14 = arith.constant 0 : index
    %23 = vector.load %arg6[%c0_13, %c0_14] : memref<32x1xf32, #tpu.memory_space<vmem>>, vector<32x1xf32>
    %24 = vector.broadcast %23 : vector<32x1xf32> to vector<32x14xf32>
    %25 = arith.addf %22, %24 : vector<32x14xf32>
    %cst_15 = arith.constant 0.000000e+00 : f32
    %26 = vector.broadcast %cst_15 : f32 to vector<32x14xf32>
    %27 = arith.maximumf %25, %26 : vector<32x14xf32>
    %28 = arith.mulf %15, %27 : vector<32x14xf32>
    %29 = vector.extract_strided_slice %28 {offsets = [0, 3], sizes = [32, 8], strides = [1, 1]} : vector<32x14xf32> to vector<32x8xf32>
    %30 = vector.extract_strided_slice %28 {offsets = [0, 0], sizes = [32, 8], strides = [1, 1]} : vector<32x14xf32> to vector<32x8xf32>
    %31 = vector.extract_strided_slice %28 {offsets = [0, 3], sizes = [32, 8], strides = [1, 1]} : vector<32x14xf32> to vector<32x8xf32>
    %32 = vector.extract_strided_slice %28 {offsets = [0, 6], sizes = [32, 8], strides = [1, 1]} : vector<32x14xf32> to vector<32x8xf32>
    %33 = tpu.concatenate %30, %31, %32 in 0 : vector<32x8xf32>, vector<32x8xf32>, vector<32x8xf32> -> vector<96x8xf32>
    %c0_16 = arith.constant 0 : index
    %c0_17 = arith.constant 0 : index
    %34 = vector.load %arg7[%c0_16, %c0_17] : memref<32x96xbf16, #tpu.memory_space<vmem>>, vector<32x96xbf16>
    %35 = arith.truncf %33 : vector<96x8xf32> to vector<96x8xbf16>
    %cst_18 = arith.constant dense<0.000000e+00> : vector<32x8xf32>
    %36 = tpu.matmul %34, %35, %cst_18 {dimension_numbers = #tpu.dot_dimension_numbers<[1], [0], [0], [1], [0, 0, 1, 1], [], []>} : vector<32x96xbf16>, vector<96x8xbf16>, vector<32x8xf32> -> vector<32x8xf32>
    %c0_19 = arith.constant 0 : index
    %c0_20 = arith.constant 0 : index
    %37 = vector.load %arg8[%c0_19, %c0_20] : memref<32x1xf32, #tpu.memory_space<vmem>>, vector<32x1xf32>
    %38 = vector.broadcast %37 : vector<32x1xf32> to vector<32x8xf32>
    %39 = arith.addf %36, %38 : vector<32x8xf32>
    %cst_21 = arith.constant 0.000000e+00 : f32
    %40 = vector.broadcast %cst_21 : f32 to vector<32x8xf32>
    %41 = arith.maximumf %39, %40 : vector<32x8xf32>
    %42 = vector.extract_strided_slice %27 {offsets = [0, 0], sizes = [32, 8], strides = [1, 1]} : vector<32x14xf32> to vector<32x8xf32>
    %43 = vector.extract_strided_slice %27 {offsets = [0, 3], sizes = [32, 8], strides = [1, 1]} : vector<32x14xf32> to vector<32x8xf32>
    %44 = vector.extract_strided_slice %27 {offsets = [0, 6], sizes = [32, 8], strides = [1, 1]} : vector<32x14xf32> to vector<32x8xf32>
    %45 = tpu.concatenate %42, %43, %44 in 0 : vector<32x8xf32>, vector<32x8xf32>, vector<32x8xf32> -> vector<96x8xf32>
    %c0_22 = arith.constant 0 : index
    %c0_23 = arith.constant 0 : index
    %46 = vector.load %arg9[%c0_22, %c0_23] : memref<32x96xbf16, #tpu.memory_space<vmem>>, vector<32x96xbf16>
    %47 = arith.truncf %45 : vector<96x8xf32> to vector<96x8xbf16>
    %cst_24 = arith.constant dense<0.000000e+00> : vector<32x8xf32>
    %48 = tpu.matmul %46, %47, %cst_24 {dimension_numbers = #tpu.dot_dimension_numbers<[1], [0], [0], [1], [0, 0, 1, 1], [], []>} : vector<32x96xbf16>, vector<96x8xbf16>, vector<32x8xf32> -> vector<32x8xf32>
    %c0_25 = arith.constant 0 : index
    %c0_26 = arith.constant 0 : index
    %49 = vector.load %arg10[%c0_25, %c0_26] : memref<32x1xf32, #tpu.memory_space<vmem>>, vector<32x1xf32>
    %50 = vector.broadcast %49 : vector<32x1xf32> to vector<32x8xf32>
    %51 = arith.addf %48, %50 : vector<32x8xf32>
    %cst_27 = arith.constant 0.000000e+00 : f32
    %52 = vector.broadcast %cst_27 : f32 to vector<32x8xf32>
    %53 = arith.maximumf %51, %52 : vector<32x8xf32>
    %54 = arith.mulf %41, %53 : vector<32x8xf32>
    %c0_28 = arith.constant 0 : index
    %c0_29 = arith.constant 0 : index
    %55 = vector.load %arg11[%c0_28, %c0_29] : memref<32x32xbf16, #tpu.memory_space<vmem>>, vector<32x32xbf16>
    %56 = arith.truncf %54 : vector<32x8xf32> to vector<32x8xbf16>
    %cst_30 = arith.constant dense<0.000000e+00> : vector<32x8xf32>
    %57 = tpu.matmul %55, %56, %cst_30 {dimension_numbers = #tpu.dot_dimension_numbers<[1], [0], [0], [1], [0, 0, 1, 1], [], []>} : vector<32x32xbf16>, vector<32x8xbf16>, vector<32x8xf32> -> vector<32x8xf32>
    %c0_31 = arith.constant 0 : index
    %c0_32 = arith.constant 0 : index
    %58 = vector.load %arg12[%c0_31, %c0_32] : memref<32x1xf32, #tpu.memory_space<vmem>>, vector<32x1xf32>
    %59 = vector.broadcast %58 : vector<32x1xf32> to vector<32x8xf32>
    %60 = arith.addf %57, %59 : vector<32x8xf32>
    %cst_33 = arith.constant 0.000000e+00 : f32
    %61 = vector.broadcast %cst_33 : f32 to vector<32x8xf32>
    %62 = arith.maximumf %60, %61 : vector<32x8xf32>
    %63 = arith.addf %29, %62 : vector<32x8xf32>
    %c0_34 = arith.constant 0 : index
    %c0_35 = arith.constant 0 : index
    %64 = vector.load %arg13[%c0_34, %c0_35] : memref<12x32xbf16, #tpu.memory_space<vmem>>, vector<12x32xbf16>
    %65 = arith.truncf %63 : vector<32x8xf32> to vector<32x8xbf16>
    %cst_36 = arith.constant dense<0.000000e+00> : vector<12x8xf32>
    %66 = tpu.matmul %64, %65, %cst_36 {dimension_numbers = #tpu.dot_dimension_numbers<[1], [0], [0], [1], [0, 0, 1, 1], [], []>} : vector<12x32xbf16>, vector<32x8xbf16>, vector<12x8xf32> -> vector<12x8xf32>
    %c0_37 = arith.constant 0 : index
    %c0_38 = arith.constant 0 : index
    %67 = vector.load %arg14[%c0_37, %c0_38] : memref<12x1xf32, #tpu.memory_space<vmem>>, vector<12x1xf32>
    %68 = vector.broadcast %67 : vector<12x1xf32> to vector<12x8xf32>
    %69 = arith.addf %66, %68 : vector<12x8xf32>
    %c0_39 = arith.constant 0 : index
    %c0_40 = arith.constant 0 : index
    %c0_41 = arith.constant 0 : index
    %70 = vector.load %arg15[%c0_39, %c0_40, %c0_41] : memref<1x12x8xf32, #tpu.memory_space<vmem>>, vector<1x12x8xf32>
    %71 = vector.shape_cast %70 : vector<1x12x8xf32> to vector<12x8xf32>
    %72 = vector.shape_cast %69 : vector<12x8xf32> to vector<1x12x8xf32>
    tpu.vector_store %arg15[%c0_39, %c0_40, %c0_41], %72 {strides = array<i32>} : memref<1x12x8xf32, #tpu.memory_space<vmem>>, vector<1x12x8xf32>,
    return
  }
  func.func @transform_0(%arg0: i32) -> (i32, i32, i32) {
    %c0_i32 = arith.constant 0 : i32
    %c0_i32_0 = arith.constant 0 : i32
    %c0_i32_1 = arith.constant 0 : i32
    return %arg0, %c0_i32, %c0_i32_0 : i32, i32, i32
  }
  func.func @transform_1(%arg0: i32) -> (i32, i32, i32) {
    %c0_i32 = arith.constant 0 : i32
    %c0_i32_0 = arith.constant 0 : i32
    %c0_i32_1 = arith.constant 0 : i32
    return %arg0, %c0_i32, %c0_i32_0 : i32, i32, i32
  }
  func.func @transform_2(%arg0: i32) -> (i32, i32) {
    %c0_i32 = arith.constant 0 : i32
    %c0_i32_0 = arith.constant 0 : i32
    %c0_i32_1 = arith.constant 0 : i32
    return %c0_i32, %c0_i32_0 : i32, i32
  }
  func.func @transform_3(%arg0: i32) -> (i32, i32) {
    %c0_i32 = arith.constant 0 : i32
    %c0_i32_0 = arith.constant 0 : i32
    %c0_i32_1 = arith.constant 0 : i32
    return %c0_i32, %c0_i32_0 : i32, i32
  }
  func.func @transform_4(%arg0: i32) -> (i32, i32) {
    %c0_i32 = arith.constant 0 : i32
    %c0_i32_0 = arith.constant 0 : i32
    %c0_i32_1 = arith.constant 0 : i32
    return %c0_i32, %c0_i32_0 : i32, i32
  }
  func.func @transform_5(%arg0: i32) -> (i32, i32) {
    %c0_i32 = arith.constant 0 : i32
    %c0_i32_0 = arith.constant 0 : i32
    %c0_i32_1 = arith.constant 0 : i32
    return %c0_i32, %c0_i32_0 : i32, i32
  }
  func.func @transform_6(%arg0: i32) -> (i32, i32) {
    %c0_i32 = arith.constant 0 : i32
    %c0_i32_0 = arith.constant 0 : i32
    %c0_i32_1 = arith.constant 0 : i32
    return %c0_i32, %c0_i32_0 : i32, i32
  }
  func.func @transform_7(%arg0: i32) -> (i32, i32) {
    %c0_i32 = arith.constant 0 : i32
    %c0_i32_0 = arith.constant 0 : i32
    %c0_i32_1 = arith.constant 0 : i32
    return %c0_i32, %c0_i32_0 : i32, i32
  }
  func.func @transform_8(%arg0: i32) -> (i32, i32) {
    %c0_i32 = arith.constant 0 : i32
    %c0_i32_0 = arith.constant 0 : i32
    %c0_i32_1 = arith.constant 0 : i32
    return %c0_i32, %c0_i32_0 : i32, i32
  }
  func.func @transform_9(%arg0: i32) -> (i32, i32) {
    %c0_i32 = arith.constant 0 : i32
    %c0_i32_0 = arith.constant 0 : i32
    %c0_i32_1 = arith.constant 0 : i32
    return %c0_i32, %c0_i32_0 : i32, i32
  }
  func.func @transform_10(%arg0: i32) -> (i32, i32) {
    %c0_i32 = arith.constant 0 : i32
    %c0_i32_0 = arith.constant 0 : i32
    %c0_i32_1 = arith.constant 0 : i32
    return %c0_i32, %c0_i32_0 : i32, i32
  }
  func.func @transform_11(%arg0: i32) -> (i32, i32) {
    %c0_i32 = arith.constant 0 : i32
    %c0_i32_0 = arith.constant 0 : i32
    %c0_i32_1 = arith.constant 0 : i32
    return %c0_i32, %c0_i32_0 : i32, i32
  }
  func.func @transform_12(%arg0: i32) -> (i32, i32) {
    %c0_i32 = arith.constant 0 : i32
    %c0_i32_0 = arith.constant 0 : i32
    %c0_i32_1 = arith.constant 0 : i32
    return %c0_i32, %c0_i32_0 : i32, i32
  }
  func.func @transform_13(%arg0: i32) -> (i32, i32) {
    %c0_i32 = arith.constant 0 : i32
    %c0_i32_0 = arith.constant 0 : i32
    %c0_i32_1 = arith.constant 0 : i32
    return %c0_i32, %c0_i32_0 : i32, i32
  }
  func.func @transform_14(%arg0: i32) -> (i32, i32, i32) {
    %c0_i32 = arith.constant 0 : i32
    %c0_i32_0 = arith.constant 0 : i32
    %c0_i32_1 = arith.constant 0 : i32
    return %arg0, %c0_i32, %c0_i32_0 : i32, i32, i32
  }
}

</mosaic_0001>

<bundles_post_ra>
// kernel: forward.1
= control target key start
LH: loop header
LB: loop body
LE: loop exit
PB: predicated region body
PF: predicated region fallthrough
CT: control target
= control target key end

     0   :  { %s1300_s29 = smov 0   ;;  %s1482_s0 = inlined_call_operand.vmem [shape: f32[2,8,16], index: 0, kind: input, shape index: {}]   ;;  %s1483_s1 = inlined_call_operand.vmem [shape: f32[2,4,16], index: 1, kind: input, shape index: {}]   ;;  %s1484_s2 = inlined_call_operand.vmem [shape: bf16[32,24], index: 2, kind: input, shape index: {}]   ;;  %s1485_s3 = inlined_call_operand.vmem [shape: f32[32,1], index: 3, kind: input, shape index: {}]   ;;  %s1486_s4 = inlined_call_operand.vmem [shape: bf16[32,12], index: 4, kind: input, shape index: {}]   ;;  %s1487_s5 = inlined_call_operand.vmem [shape: f32[32,1], index: 5, kind: input, shape index: {}]   ;;  %s1488_s6 = inlined_call_operand.vmem [shape: bf16[32,96], index: 6, kind: input, shape index: {}]   ;;  %s1489_s7 = inlined_call_operand.vmem [shape: f32[32,1], index: 7, kind: input, shape index: {}]   ;;  %s1490_s8 = inlined_call_operand.vmem [shape: bf16[32,96], index: 8, kind: input, shape index: {}]   ;;  %s1491_s9 = inlined_call_operand.vmem [shape: f32[32,1], index: 9, kind: input, shape index: {}]   ;;  %s1492_s10 = inlined_call_operand.vmem [shape: bf16[32,32], index: 10, kind: input, shape index: {}]   ;;  %s1493_s11 = inlined_call_operand.vmem [shape: f32[32,1], index: 11, kind: input, shape index: {}]   ;;  %s1494_s12 = inlined_call_operand.vmem [shape: bf16[12,32], index: 12, kind: input, shape index: {}]   ;;  %s1495_s13 = inlined_call_operand.vmem [shape: f32[12,1], index: 13, kind: input, shape index: {}]   ;;  %s1496_s14 = inlined_call_operand.vmem [shape: f32[2,12,8], index: 14, kind: output, shape index: {}]  }
   0x1 LB: > { %s1066_s30 = sadd.s32 4294967295, %s1217_s29   ;;  %p1070_p0 = scmp.ge.s32.totalorder %s1217_s29, 1  ;;  %s1217_s29 = sphi %s1300_s29, %s24_s29  }
   0x2   : > { %p420_p1 = scmp.lt.s32.totalorder %s1217_s29, 3 }
   0x4   : > { %p421_p2 = pnand %p1070_p0, %p420_p1 }
   0x5   : > { %p469_p3 = scmp.lt.s32.totalorder (!%p421_p2), %s1066_s30, 1  ;;  %s1219_s23 = smov (!%p421_p2), 126  }
   0x6   : > { %424 = sbr.rel (%p421_p2) target bundleno = 1151 (0x47f), region = 76  ;;  %s1220_s24 = smov (!%p421_p2), 127  }
   0x7   : > { %s1222_s21 = smov (!%p421_p2), 122  }
   0xb   : > { %s1498_s30 = smov (!%p469_p3, %s1066_s30), 1  ;;  %v1221_v5 = vmov 0   ;;  %v500_v6 = vld [vmem:[%s1485_s3 + $0x10] sm:$0xff]  ;;  %v501_v7 = vld [vmem:[%s1485_s3 + $0x18] sm:$0xff]  ;;  %v498_v8 = vld [vmem:[%s1485_s3] sm:$0xff]  ;;  %vm539_vm0 = vcmask 1043456  }
   0xc   : > { %s1071_s15 = sshll.u32 %s1498_s30, 3  ;;  %s1072_s16 = sshll.u32 %s1498_s30, 2  ;;  %1168 = vset.pattern.permute.xlu1 %v1221_v5  ;;  %1170 = vset.pattern.permute.xlu0 %v1221_v5  ;;  %v499_v9 = vld [vmem:[%s1485_s3 + $0x8] sm:$0xff]  ;;  %v582_v13 = vld [vmem:[%s1487_s5 + $0x10] sm:$0xff]  ;;  %v583_v17 = vld [vmem:[%s1487_s5 + $0x18] sm:$0xff]  ;;  %vm621_vm1 = vcmask 1045504  }
   0xd   : > { %s472_s19 = scalar_lea.vmem %s1482_s0, %s1071_s15  ;;  %s476_s22 = scalar_lea.vmem %s1483_s1, %s1072_s16  ;;  %1169 = vset.pattern.permute.xlu2 %v1221_v5  ;;  %514 = vperm.xlu1 %1168, %v500_v6   ;;  %v581_v10 = vld [vmem:[%s1487_s5 + $0x8] sm:$0xff]  ;;  %v1133_v24 = vld [vmem:[%s1484_s2] sm:$0xff]  ;;  %vm532_vm2 = vcmask 195584   ;;  %vm614_vm3 = vcmask 97280   ;;  %vm724_vm4 = vcmask 785408   ;;  %vm899_vm5 = vcmask 261120  }
   0xe   : > { %v483_v0 = vld [vmem:[%s472_s19] sm:$0xff]  ;;  %596 = vperm.xlu2 %1169, %v582_v13   ;;  %v1134_v28 = vld [vmem:[%s1484_s2 + $0x8] sm:$0xff]  ;;  %s1224_s19 = smov 3   ;;  %s1132_s15 = sshll.u32 %s1498_s30, 4  ;;  %vm995_vm6 = vcmask 64512   ;;  %vm997_vm7 = vcmask 60416  }
   0xf   : > { %v484_v1 = vld [vmem:[%s476_s22] sm:$0xf]  ;;  %v1136_v29 = vld [vmem:[%s1486_s4 + $0x8] sm:$0xff]  ;;  %s1223_s22 = smov 125  }
  0x10   : > { %v1158_v2 = vpack.i.bf16 %v484_v1, %v483_v0  ;;  %v567_v3 = vrot.slane %v484_v1, 4  ;;  %v1135_v26 = vld [vmem:[%s1486_s4] sm:$0xff]  ;;  %v691_v13 = vld [vmem:[%s1489_s7 + $0x8] sm:$0xff] }
  0x11   : > { %v580_v27 = vld [vmem:[%s1487_s5] sm:$0xff] }
  0x12   : > { %1159 = vrot.lane.b32.xlu0 %v1158_v2, %s1219_s23  ;;  %v1163_v4 = vpack.i.bf16 %v483_v0, %v567_v3 }
  0x15   : > { %519 = vperm.xlu1 %1168, %v501_v7   ;;  %v692_v7 = vld [vmem:[%s1489_s7 + $0x10] sm:$0xff] }
  0x16   : > { %601 = vperm.xlu2 %1169, %v583_v17   ;;  %v793_v17 = vld [vmem:[%s1491_s9 + $0x8] sm:$0xff] }
  0x1a   : > { %1164 = vrot.lane.b32.xlu0 %v1163_v4, %s1220_s24 }
  0x1d   : > { %509 = vperm.xlu1 %1168, %v499_v9   ;;  %v795_v9 = vld [vmem:[%s1491_s9 + $0x18] sm:$0xff] }
  0x1e   : > { %586 = vperm.xlu2 %1169, %v580_v27  }
  0x22   : > { %504 = vperm.xlu0 %1170, %v498_v8  }
  0x25   : > { %591 = vperm.xlu1 %1168, %v581_v10   ;;  %v794_v10 = vld [vmem:[%s1491_s9 + $0x10] sm:$0xff] }
  0x68   : > { %v597_v31 = vpop.permute.xlu2 %596 }
  0x70   : > { %v602_v33 = vpop.permute.xlu2 %601 }
  0x78   : > { %v587_v37 = vpop.permute.xlu2 %586 }
  0x7f   : > { %v515_v30 = vpop.permute.xlu1 %514 }
  0x84   : > { %v1160_v11 = vpop.permute.xlu0 %1159 }
  0x85   : > { %v1161_v12 = vunpack.i.l.bf16 %v1160_v11  ;;  %v1162_v20 = vunpack.i.h.bf16 %v1160_v11  ;;  %v792_v11 = vld [vmem:[%s1491_s9] sm:$0xff] }
  0x87   : > { %v497_v14 = vpack.c.bf16 %v1161_v12, %v1161_v12  ;;  %v520_v32 = vpop.permute.xlu1 %519  ;;  %v693_v12 = vld [vmem:[%s1489_s7 + $0x18] sm:$0xff] }
  0x89   : > { %v541_v15 = vsel %vm539_vm0, %v497_v14, 0  ;;  %v868_v14 = vld [vmem:[%s1493_s11 + $0x18] sm:$0xff] }
  0x8a   : > { %549 = vmatpush.bf16.msra.mxu0 %v541_v15  ;;  %v690_v15 = vld [vmem:[%s1489_s7] sm:$0xff] }
  0x8c   : > { %v1165_v16 = vpop.permute.xlu0 %1164 }
  0x8d   : > { %v1167_v18 = vunpack.i.h.bf16 %v1165_v16  ;;  %v1166_v19 = vunpack.i.l.bf16 %v1165_v16  ;;  %v867_v16 = vld [vmem:[%s1493_s11 + $0x10] sm:$0xff] }
  0x8f   : > { %v496_v21 = vpack.c.bf16 %v1167_v18, %v483_v0  ;;  %v574_v22 = vsel %vm539_vm0, %v484_v1, %v1166_v19  ;;  %v510_v34 = vpop.permute.xlu1 %509  ;;  %v866_v18 = vld [vmem:[%s1493_s11 + $0x8] sm:$0xff]  ;;  %v865_v19 = vld [vmem:[%s1493_s11] sm:$0xff] }
  0x90   : > { %v579_v23 = vpack.c.bf16 %v1162_v20, %v574_v22 }
  0x91   : > { %550 = vmatpush.bf16.msra.mxu0 %v496_v21 }
  0x92   : > { %v623_v25 = vsel %vm621_vm1, %v579_v23, 0 }
  0x93   : > { %632 = vmatpush.bf16.msra.mxu1 %v623_v25 }
  0x94   : > { %1083 = vmatmul.msk.bf16.vlgmr.msra.gmra.mxu0 %vm532_vm2, %v1133_v24  ;;  %v505_v38 = vpop.permute.xlu0 %504 }
  0x96   : > { %1093 = vmatmul.msk.bf16.vlgmr.msra.gmra.mxu1 %vm614_vm3, %v1135_v26 }
  0x97   : > { %v592_v43 = vpop.permute.xlu1 %591 }
  0xa4   : > { %1084 = vmatmul.msk.bf16.gmra.mxu0 %vm532_vm2, %v1134_v28 }
  0xa6   : > { %1094 = vmatmul.msk.bf16.gmra.mxu1 %vm614_vm3, %v1136_v29 }
 0x111   : > { %v552_v35 = vpop.f32.mrf.mxu0 }
 0x112   : > { %v553_v39 = vadd.f32 %v552_v35, %v505_v38 }
 0x113   : > { %v634_v36 = vpop.f32.mrf.mxu1 }
 0x114   : > { %v635_v40 = vadd.f32 %v634_v36, %v587_v37  ;;  %v562_v45 = vmax.f32 %v553_v39, 0.0 }
 0x116   : > { %v1354_v46 = vmax.f32 %v635_v40, 0.0 }
 0x118   : > { %v1359_v50 = vmul.f32 %v1354_v46, %v562_v45 }
 0x119   : > { %v554_v41 = vpop.f32.mrf.mxu0 }
 0x11a   : > { %v555_v42 = vadd.f32 %v554_v41, %v510_v34 }
 0x11b   : > { %v636_v44 = vpop.f32.mrf.mxu1 }
 0x11c   : > { %v637_v47 = vadd.f32 %v636_v44, %v592_v43  ;;  %v563_v48 = vmax.f32 %v555_v42, 0.0 }
 0x11e   : > { %v1356_v49 = vmax.f32 %v637_v47, 0.0 }
 0x120   : > { %v1362_v51 = vmul.f32 %v1356_v49, %v563_v48  ;;  %v786_v52 = vpack.c.bf16 %v1356_v49, %v1354_v46  ;;  %v1186_v8 = vpack.i.bf16 %v1356_v49, %v1354_v46 }
 0x121   : > { %v557_v53 = vpop.f32.mrf.mxu0 }
 0x122   : > { %v1171_v54 = vpack.i.bf16 %v1362_v51, %v1359_v50  ;;  %v558_v57 = vadd.f32 %v557_v53, %v515_v30 }
 0x123   : > { %v639_v55 = vpop.f32.mrf.mxu1 }
 0x124   : > { %1172 = vrot.lane.b32.xlu1 %v1171_v54, %s1222_s21  ;;  %v640_v56 = vadd.f32 %v639_v55, %v597_v31  ;;  %v564_v63 = vmax.f32 %v558_v57, 0.0 }
 0x126   : > { %v1368_v60 = vmax.f32 %v640_v56, 0.0 }
 0x128   : > { %v1373_v2 = vmul.f32 %v1368_v60, %v564_v63 }
 0x129   : > { %v559_v58 = vpop.f32.mrf.mxu0 }
 0x12a   : > { %v560_v59 = vadd.f32 %v559_v58, %v520_v32  ;;  %v684_v58 = vpack.c.bf16 %v1362_v51, %v1359_v50 }
 0x12b   : > { %v641_v61 = vpop.f32.mrf.mxu1 }
 0x12c   : > { %v642_v62 = vadd.f32 %v641_v61, %v602_v33  ;;  %v565_v0 = vmax.f32 %v560_v59, 0.0  ;;  %v1137_v59 = vld [vmem:[%s1488_s6] sm:$0xff] }
 0x12d   : > { %v1139_v61 = vld [vmem:[%s1490_s8] sm:$0xff] }
 0x12e   : > { %v1370_v1 = vmax.f32 %v642_v62, 0.0  ;;  %v1138_v62 = vld [vmem:[%s1488_s6 + $0x8] sm:$0xff] }
 0x130   : > { %v1376_v3 = vmul.f32 %v1370_v1, %v565_v0  ;;  %v1176_v4 = vpack.i.bf16 %v1370_v1, %v1368_v60  ;;  %v787_v5 = vpack.c.bf16 %v1370_v1, %v1368_v60  ;;  %v1140_v60 = vld [vmem:[%s1490_s8 + $0x8] sm:$0xff] }
 0x132   : > { %1177 = vrot.lane.b32.xlu0 %v1176_v4, %s1222_s21  ;;  %1192 = vrot.lane.b32.xlu1 %v1176_v4, %s1223_s22  ;;  %v1181_v6 = vpack.i.bf16 %v1376_v3, %v1373_v2  ;;  %v685_v56 = vpack.c.bf16 %v1376_v3, %v1373_v2 }
 0x134   : > { %1182 = vrot.lane.b32.xlu2 %v1181_v6, %s1222_s21 }
 0x13a   : > { %1202 = vrot.lane.b32.xlu0 %v1181_v6, %s1223_s22  ;;  %706 = vperm.xlu1 %1168, %v692_v7  }
 0x13c   : > { %1187 = vrot.lane.b32.xlu2 %v1186_v8, %s1222_s21 }
 0x142   : > { %1207 = vrot.lane.b32.xlu0 %v1186_v8, %s1223_s22  ;;  %813 = vperm.xlu1 %1168, %v795_v9  }
 0x144   : > { %1197 = vrot.lane.b32.xlu2 %v1171_v54, %s1223_s22 }
 0x14a   : > { %808 = vperm.xlu0 %1170, %v794_v10   ;;  %798 = vperm.xlu1 %1168, %v792_v11  }
 0x14c   : > { %711 = vperm.xlu2 %1169, %v693_v12  }
 0x152   : > { %701 = vperm.xlu0 %1170, %v691_v13   ;;  %886 = vperm.xlu1 %1168, %v868_v14  }
 0x154   : > { %696 = vperm.xlu2 %1169, %v690_v15  }
 0x15a   : > { %881 = vperm.xlu0 %1170, %v867_v16  }
 0x15c   : > { %803 = vperm.xlu2 %1169, %v793_v17  }
 0x162   : > { %876 = vperm.xlu0 %1170, %v866_v18  }
 0x164   : > { %871 = vperm.xlu2 %1169, %v865_v19  }
 0x18e   : > { %v1183_v20 = vpop.permute.xlu2 %1182 }
 0x18f   : > { %v1185_v21 = vunpack.i.h.bf16 %v1183_v20  ;;  %v1184_v22 = vunpack.i.l.bf16 %v1183_v20 }
 0x191   : > { %v689_v23 = vpack.c.bf16 %v1185_v21, %v1184_v22 }
 0x193   : > { %733 = vmatpush.bf16.msra.mxu2 %v689_v23 }
 0x196   : > { %v1173_v24 = vpop.permute.xlu1 %1172  ;;  %v1188_v28 = vpop.permute.xlu2 %1187 }
 0x197   : > { %v1175_v25 = vunpack.i.h.bf16 %v1173_v24  ;;  %v1174_v26 = vunpack.i.l.bf16 %v1173_v24  ;;  %v1190_v32 = vunpack.i.h.bf16 %v1188_v28  ;;  %v1189_v33 = vunpack.i.l.bf16 %v1188_v28 }
 0x199   : > { %v688_v27 = vpack.c.bf16 %v1175_v25, %v1174_v26  ;;  %v790_v38 = vpack.c.bf16 %v1190_v32, %v1189_v33 }
 0x19b   : > { %734 = vmatpush.bf16.msra.mxu2 %v688_v27 }
 0x19e   : > { %v1198_v39 = vpop.permute.xlu2 %1197 }
 0x19f   : > { %v1200_v43 = vunpack.i.h.bf16 %v1198_v39  ;;  %v1199_v44 = vunpack.i.l.bf16 %v1198_v39 }
 0x1a1   : > { %v686_v48 = vpack.c.bf16 %v1200_v43, %v1199_v44 }
 0x1a4   : > { %v1178_v29 = vpop.permute.xlu0 %1177  ;;  %v1193_v35 = vpop.permute.xlu1 %1192 }
 0x1a5   : > { %v1180_v30 = vunpack.i.h.bf16 %v1178_v29  ;;  %v1179_v31 = vunpack.i.l.bf16 %v1178_v29  ;;  %v1195_v36 = vunpack.i.h.bf16 %v1193_v35  ;;  %v1194_v37 = vunpack.i.l.bf16 %v1193_v35 }
 0x1a6   : > { %v712_v1 = vpop.permute.xlu2 %711 }
 0x1a7   : > { %v791_v34 = vpack.c.bf16 %v1180_v30, %v1179_v31  ;;  %v789_v47 = vpack.c.bf16 %v1195_v36, %v1194_v37  ;;  %v1141_v36 = vld [vmem:[%s1492_s10] sm:$0xff]  ;;  %v1142_v37 = vld [vmem:[%s1492_s10 + $0x8] sm:$0xff] }
 0x1a9   : > { %834 = vmatpush.bf16.msra.mxu3 %v791_v34 }
 0x1ac   : > { %v1203_v40 = vpop.permute.xlu0 %1202  ;;  %v707_v4 = vpop.permute.xlu1 %706 }
 0x1ad   : > { %v1205_v41 = vunpack.i.h.bf16 %v1203_v40  ;;  %v1204_v42 = vunpack.i.l.bf16 %v1203_v40  ;;  %835 = vmatpush.bf16.msra.mxu3 %v790_v38 }
 0x1ae   : > { %v697_v7 = vpop.permute.xlu2 %696 }
 0x1af   : > { %v687_v45 = vpack.c.bf16 %v1205_v41, %v1204_v42 }
 0x1b1   : > { %735 = vmatpush.bf16.msra.mxu2 %v687_v45  ;;  %836 = vmatpush.bf16.msra.mxu3 %v789_v47 }
 0x1b4   : > { %v1208_v53 = vpop.permute.xlu0 %1207  ;;  %v814_v49 = vpop.permute.xlu1 %813 }
 0x1b5   : > { %v1210_v54 = vunpack.i.h.bf16 %v1208_v53  ;;  %v1209_v55 = vunpack.i.l.bf16 %v1208_v53  ;;  %736 = vmatpush.bf16.msra.mxu2 %v686_v48 }
 0x1b6   : > { %v804_v11 = vpop.permute.xlu2 %803 }
 0x1b7   : > { %v788_v57 = vpack.c.bf16 %v1210_v54, %v1209_v55 }
 0x1b9   : > { %737 = vmatpush.bf16.msra.mxu2 %v685_v56  ;;  %837 = vmatpush.bf16.msra.mxu3 %v788_v57 }
 0x1bc   : > { %v799_v12 = vpop.permute.xlu1 %798 }
 0x1bd   : > { %738 = vmatpush.bf16.msra.mxu2 %v684_v58  ;;  %838 = vmatpush.bf16.msra.mxu3 %v787_v5 }
 0x1be   : > { %v872_v38 = vpop.permute.xlu2 %871 }
 0x1c0   : > { %1103 = vmatmul.msk.bf16.vlgmr.msra.gmra.mxu2 %vm724_vm4, %v1137_v59  ;;  %v953_v59 = vld [vmem:[%s1495_s13] sm:$0xff] }
 0x1c1   : > { %839 = vmatpush.bf16.msra.mxu3 %v786_v52  ;;  %v809_v52 = vpop.permute.xlu0 %808 }
 0x1c4   : > { %1113 = vmatmul.msk.bf16.vlgmr.msra.gmra.mxu3 %vm724_vm4, %v1139_v61  ;;  %v887_v54 = vpop.permute.xlu1 %886 }
 0x1c9   : > { %v702_v16 = vpop.permute.xlu0 %701 }
 0x1d0   : > { %1104 = vmatmul.msk.bf16.gmra.mxu2 %vm724_vm4, %v1138_v62 }
 0x1d1   : > { %v882_v43 = vpop.permute.xlu0 %881 }
 0x1d4   : > { %1114 = vmatmul.msk.bf16.gmra.mxu3 %vm724_vm4, %v1140_v60 }
 0x1d9   : > { %v877_v48 = vpop.permute.xlu0 %876 }
 0x243   : > { %v740_v63 = vpop.f32.mrf.mxu2 }
 0x244   : > { %v741_v22 = vadd.f32 %v740_v63, %v697_v7  ;;  %v954_v7 = vld [vmem:[%s1495_s13 + $0x8] sm:$0xf] }
 0x246   : > { %v750_v31 = vmax.f32 %v741_v22, 0.0 }
 0x247   : > { %v841_v0 = vpop.f32.mrf.mxu3 }
 0x248   : > { %v842_v18 = vadd.f32 %v841_v0, %v799_v12 }
 0x24a   : > { %v851_v27 = vmax.f32 %v842_v18, 0.0 }
 0x24b   : > { %v742_v5 = vpop.f32.mrf.mxu2 }
 0x24c   : > { %v743_v19 = vadd.f32 %v742_v5, %v702_v16  ;;  %v855_v34 = vmul.f32 %v851_v27, %v750_v31 }
 0x24e   : > { %v751_v28 = vmax.f32 %v743_v19, 0.0 }
 0x24f   : > { %v843_v6 = vpop.f32.mrf.mxu3 }
 0x250   : > { %v844_v13 = vadd.f32 %v843_v6, %v804_v11 }
 0x252   : > { %v852_v23 = vmax.f32 %v844_v13, 0.0 }
 0x253   : > { %v745_v46 = vpop.f32.mrf.mxu2 }
 0x254   : > { %v746_v14 = vadd.f32 %v745_v46, %v707_v4  ;;  %v856_v32 = vmul.f32 %v852_v23, %v751_v28 }
 0x256   : > { %v752_v24 = vmax.f32 %v746_v14, 0.0  ;;  %v863_v35 = vpack.c.bf16 %v856_v32, %v855_v34 }
 0x257   : > { %v846_v8 = vpop.f32.mrf.mxu3 }
 0x258   : > { %v847_v10 = vadd.f32 %v846_v8, %v809_v52 }
 0x25a   : > { %v853_v20 = vmax.f32 %v847_v10, 0.0 }
 0x25b   : > { %v747_v9 = vpop.f32.mrf.mxu2 }
 0x25c   : > { %v748_v15 = vadd.f32 %v747_v9, %v712_v1  ;;  %v857_v29 = vmul.f32 %v853_v20, %v752_v24 }
 0x25e   : > { %v753_v25 = vmax.f32 %v748_v15, 0.0 }
 0x25f   : > { %v848_v17 = vpop.f32.mrf.mxu3 }
 0x260   : > { %v849_v21 = vadd.f32 %v848_v17, %v814_v49 }
 0x262   : > { %v854_v26 = vmax.f32 %v849_v21, 0.0 }
 0x264   : > { %v858_v30 = vmul.f32 %v854_v26, %v753_v25 }
 0x266   : > { %v864_v33 = vpack.c.bf16 %v858_v30, %v857_v29 }
 0x268   : > { %912 = vmatpush.bf16.msrb.mxu1 %v864_v33 }
 0x26c   : > { %913 = vmatpush.bf16.msrb.mxu1 %v863_v35 }
 0x26f   : > { %1123 = vmatmul.msk.bf16.vlgmr.msrb.gmra.mxu1 %vm899_vm5, %v1141_v36 }
 0x27f   : > { %1124 = vmatmul.msk.bf16.gmra.mxu1 %vm899_vm5, %v1142_v37 }
 0x2ec   : > { %v915_v39 = vpop.f32.mrf.mxu1 }
 0x2ed   : > { %v916_v40 = vadd.f32 %v915_v39, %v872_v38 }
 0x2ef   : > { %v925_v41 = vmax.f32 %v916_v40, 0.0 }
 0x2f1   : > { %933 = vrot.lane.b32.xlu0 %v925_v41, %s1224_s19 }
 0x2f4   : > { %v917_v42 = vpop.f32.mrf.mxu1 }
 0x2f5   : > { %v918_v53 = vadd.f32 %v917_v42, %v877_v48 }
 0x2f7   : > { %v926_v57 = vmax.f32 %v918_v53, 0.0 }
 0x2fc   : > { %v920_v44 = vpop.f32.mrf.mxu1 }
 0x2fd   : > { %v921_v45 = vadd.f32 %v920_v44, %v882_v43 }
 0x2ff   : > { %v927_v47 = vmax.f32 %v921_v45, 0.0 }
 0x301   : > { %937 = vrot.lane.b32.xlu1 %v927_v47, %s1224_s19 }
 0x304   : > { %v922_v55 = vpop.f32.mrf.mxu1 }
 0x305   : > { %v923_v56 = vadd.f32 %v922_v55, %v887_v54 }
 0x307   : > { %v928_v58 = vmax.f32 %v923_v56, 0.0 }
 0x309   : > { %939 = vrot.lane.b32.xlu2 %v928_v58, %s1224_s19  ;;  %935 = vrot.lane.b32.xlu1 %v926_v57, %s1224_s19 }
 0x311   : > { %957 = vperm.xlu1 %1168, %v953_v59  }
 0x363   : > { %v940_v61 = vpop.permute.xlu2 %939  ;;  %v934_v1 = vpop.permute.xlu0 %933 }
 0x364   : > { %v948_v60 = vadd.f32 %v940_v61, %v1376_v3  ;;  %v945_v5 = vadd.f32 %v934_v1, %v1359_v50  ;;  %v1143_v50 = vld [vmem:[%s1494_s12] sm:$0x30] }
 0x373   : > { %v938_v62 = vpop.permute.xlu1 %937 }
 0x374   : > { %v947_v63 = vadd.f32 %v938_v62, %v1373_v2  ;;  %v1127_v2 = vld [vmem:[%s1494_s12] sm:$0xf] }
 0x376   : > { %v952_v0 = vpack.c.bf16 %v948_v60, %v947_v63 }
 0x378   : > { %974 = vrot.lane.b32.xlu2 %v952_v0, %s1223_s22 }
 0x37b   : > { %v936_v4 = vpop.permute.xlu1 %935 }
 0x37c   : > { %v946_v6 = vadd.f32 %v936_v4, %v1362_v51  ;;  %v1128_v51 = vor.u32 %v1143_v50, %v1127_v2 }
 0x37e   : > { %v951_v46 = vpack.c.bf16 %v946_v6, %v945_v5 }
 0x380   : > { %962 = vperm.xlu2 %1169, %v954_v7   ;;  %972 = vrot.lane.b32.xlu0 %v951_v46, %s1223_s22  ;;  %s481_s22 = scalar_lea.vmem %s1496_s14, %s1132_s15 }
 0x383   : > { %v958_v52 = vpop.permute.xlu1 %957 }
 0x3d2   : > { %v975_v3 = vpop.permute.xlu2 %974 }
 0x3d3   : > { %987 = vmatpush.bf16.msrb.mxu0 %v975_v3 }
 0x3da   : > { %v963_v10 = vpop.permute.xlu2 %962 }
 0x3f2   : > { %v973_v49 = vpop.permute.xlu0 %972 }
 0x3f3   : > { %988 = vmatpush.bf16.msrb.mxu0 %v973_v49 }
 0x3f6   : > { %1129 = vmatmul.msk.bf16.vlgmr.msrb.gmra.mxu0 %vm899_vm5, %v1128_v51 }
 0x473   : > { %v990_v8 = vpop.f32.mrf.mxu0 }
 0x474   : > { %v991_v9 = vadd.f32 %v990_v8, %v958_v52 }
 0x476   : > { %996 = vst.msk [vmem:[%s481_s22] sm:$0xff] %vm995_vm6, %v991_v9 }
 0x47b   : > { %v992_v11 = vpop.f32.mrf.mxu0 }
 0x47c   : > { %v993_v12 = vadd.f32 %v992_v11, %v963_v10 }
 0x47e   : > { %998 = vst.msk [vmem:[%s481_s22 + $0x8] sm:$0xf] %vm997_vm7, %v993_v12 }
 0x47f PF: > { %s24_s29 = sadd.s32 1, %s1217_s29  }
 0x480   : > { %p21_p4 = scmp.ge.s32.totalorder %s24_s29, 4  }
 0x482   :  { %23 = sbr.rel (!%p21_p4) target bundleno = 1 (0x1), region = 109 }

</bundles_post_ra>
